<compile_context>
chip_gen: v7x
topology: tpu7x:2x2x1
jax: 0.10.0
libtpu: 0.0.40
codegen_flags: <defaults>
</compile_context>

<pallas_src>
import functools

import jax
import jax.numpy as jnp
from jax.experimental import pallas as pl
from jax.experimental.pallas import tpu as pltpu


def actor_kernel(x_ref, w1_ref, b1_ref, w2_ref, b2_ref, w3_ref, b3_ref, o_ref):
    # Compute dtype follows the (tiny, VMEM-resident) weights; x is loaded in
    # its HBM dtype (f32) and cast in-register, so the wrapper never needs a
    # separate HBM cast pass over the activations.
    cdt = w1_ref.dtype
    x = x_ref[...].astype(cdt)

    # fc1 + ReLU (MXU matmul, f32 accumulation; bias is a (1, H) lane row)
    h1 = jnp.dot(x, w1_ref[...], preferred_element_type=jnp.float32) + b1_ref[...]
    h1 = jnp.maximum(h1, 0.0).astype(cdt)

    # fc2 + ReLU
    h2 = jnp.dot(h1, w2_ref[...], preferred_element_type=jnp.float32) + b2_ref[...]
    h2 = jnp.maximum(h2, 0.0).astype(cdt)

    # fc3 -> logits stay f32 for a numerically stable softmax
    logits = jnp.dot(h2, w3_ref[...], preferred_element_type=jnp.float32) + b3_ref[...]

    # softmax over the action dim (FLAG_CONTINUOUS_ACTION == False path).
    # Exact divide: every output row sums to 1 to f32 precision.
    m = jnp.max(logits, axis=-1, keepdims=True)
    e = jnp.exp(logits - m)
    s = jnp.sum(e, axis=-1, keepdims=True)
    o_ref[...] = (e / s).astype(o_ref.dtype)


def _round_up(n, m):
    return ((n + m - 1) // m) * m


@functools.partial(jax.jit, static_argnames=("tile_batch", "compute_dtype"))
def actor_forward(x, params, *, tile_batch=2048, compute_dtype=jnp.float32):
    """Fused ActorNetwork forward: softmax(relu(relu(x@W1+b1)@W2+b2)@W3+b3)."""
    w1, b1, w2, b2, w3, b3 = params
    in_size, hidden = w1.shape
    out_size = w3.shape[1]
    batch = x.shape[0]

    # Only the tiny grid-invariant weights are cast to the compute dtype; x is
    # passed to the kernel as-is (casting it here would add a full HBM pass).
    w1c = w1.astype(compute_dtype)
    w2c = w2.astype(compute_dtype)
    w3c = w3.astype(compute_dtype)

    # Adaptive batch tile: one grid step for small batches, capped at
    # `tile_batch` rows (multiple of 8 sublanes) for large ones. The pad (if
    # any) lives inside this jit, so it fuses rather than being a standalone
    # HBM copy in front of a memory-bound kernel.
    tb = _round_up(max(min(int(tile_batch), batch), 8), 8)
    padded = _round_up(batch, tb)
    x_in = x if padded == batch else jnp.pad(x, ((0, padded - batch), (0, 0)))
    grid = (padded // tb,)

    # Advisory cost so XLA schedules this small custom call sensibly.
    flops = 2 * padded * (in_size * hidden + hidden * hidden + hidden * out_size)
    bytes_accessed = (
        x_in.size * x_in.dtype.itemsize
        + padded * out_size * 4
        + sum(int(a.size) * a.dtype.itemsize for a in (w1c, b1, w2c, b2, w3c, b3))
    )
    cost = pl.CostEstimate(
        flops=int(flops),
        transcendentals=int(padded * out_size),  # exp
        bytes_accessed=int(bytes_accessed),
    )

    # x / out march along the batch; weights & biases are grid-invariant
    # (constant index_map -> stay VMEM-resident across all grid steps, while
    # BlockSpec double-buffering overlaps the x/out HBM traffic with compute).
    in_specs = [
        pl.BlockSpec((tb, in_size), lambda i: (i, 0)),       # x tile
        pl.BlockSpec((in_size, hidden), lambda i: (0, 0)),   # w1
        pl.BlockSpec((1, hidden), lambda i: (0, 0)),         # b1
        pl.BlockSpec((hidden, hidden), lambda i: (0, 0)),    # w2
        pl.BlockSpec((1, hidden), lambda i: (0, 0)),         # b2
        pl.BlockSpec((hidden, out_size), lambda i: (0, 0)),  # w3
        pl.BlockSpec((1, out_size), lambda i: (0, 0)),       # b3
    ]
    out_specs = pl.BlockSpec((tb, out_size), lambda i: (i, 0))

    # NOTE: out_size=8 < 128 lanes -> stores are lane-masked; lane-densifying
    # the output layout is only worth it if profiling shows the store path
    # binding (it does not at these feature sizes).
    out = pl.pallas_call(
        actor_kernel,
        out_shape=jax.ShapeDtypeStruct((padded, out_size), jnp.float32),
        grid=grid,
        in_specs=in_specs,
        out_specs=out_specs,
        compiler_params=pltpu.CompilerParams(
            dimension_semantics=("parallel",),  # batch tiles are independent
        ),
        cost_estimate=cost,
    )(x_in, w1c, b1, w2c, b2, w3c, b3)

    return out[:batch]


def init_params(key, input_size, hidden_size, output_size):
    """Deterministic PyTorch-Linear-style init (uniform +/- 1/sqrt(fan_in))."""
    ks = jax.random.split(key, 6)

    def linear(kw, kb, fan_in, fan_out):
        bound = 1.0 / jnp.sqrt(fan_in)
        w = jax.random.uniform(kw, (fan_in, fan_out), jnp.float32, -bound, bound)
        b = jax.random.uniform(kb, (1, fan_out), jnp.float32, -bound, bound)
        return w, b

    w1, b1 = linear(ks[0], ks[1], input_size, hidden_size)
    w2, b2 = linear(ks[2], ks[3], hidden_size, hidden_size)
    w3, b3 = linear(ks[4], ks[5], hidden_size, output_size)
    return (w1, b1, w2, b2, w3, b3)


if __name__ == "__main__":
    key = jax.random.PRNGKey(0)
    k_param, k_x = jax.random.split(key)

    input_size, hidden_size, output_size = 16, 32, 8
    params = init_params(k_param, input_size, hidden_size, output_size)

    def reference(x):
        w1, b1, w2, b2, w3, b3 = params
        h = jnp.maximum(x @ w1 + b1, 0.0)
        h = jnp.maximum(h @ w2 + b2, 0.0)
        return jax.nn.softmax(h @ w3 + b3, axis=-1)

    # (batch, tile_batch) cases:
    #   (64, 2048)  -> single exact tile, grid=(1,)
    #   (200, 2048) -> ragged batch, pads to 208 inside jit, grid=(1,)
    #   (200, 64)   -> multi-step grid (pads to 256, grid=(4,))
    for batch, tb in ((64, 2048), (200, 2048), (200, 64)):
        x = jax.random.normal(jax.random.fold_in(k_x, batch),
                              (batch, input_size), jnp.float32)
        out = jax.block_until_ready(actor_forward(x, params, tile_batch=tb))
        ref = reference(x)
        assert out.shape == (batch, output_size)
        assert jnp.allclose(out, ref, atol=2e-3), "f32 path mismatch vs reference"
        # exact-divide softmax: rows sum to 1 to f32 precision
        assert jnp.allclose(jnp.sum(out, axis=-1), 1.0, atol=1e-5)

    # Optional bf16-weight path (bf16 MXU on v6e/v7x). x stays f32 in HBM and
    # is cast inside the kernel, so there is no extra wrapper HBM pass.
    x = jax.random.normal(k_x, (200, input_size), jnp.float32)
    out_bf16 = jax.block_until_ready(
        actor_forward(x, params, compute_dtype=jnp.bfloat16))
    assert out_bf16.shape == (200, output_size)
    assert jnp.allclose(out_bf16, reference(x), atol=5e-2), "bf16 path mismatch"

    print("KERNEL_OK")
</pallas_src>

<mosaic_0001>
module attributes {stable_mosaic.version = 11 : i64} {
  func.func @actor_kernel(%arg0: i32, %arg1: memref<64x16xf32, #tpu.memory_space<vmem>>, %arg2: memref<16x32xf32, #tpu.memory_space<vmem>>, %arg3: memref<1x32xf32, #tpu.memory_space<vmem>>, %arg4: memref<32x32xf32, #tpu.memory_space<vmem>>, %arg5: memref<1x32xf32, #tpu.memory_space<vmem>>, %arg6: memref<32x8xf32, #tpu.memory_space<vmem>>, %arg7: memref<1x8xf32, #tpu.memory_space<vmem>>, %arg8: memref<64x8xf32, #tpu.memory_space<vmem>>) attributes {dimension_semantics = [#tpu.dimension_semantics<parallel>], iteration_bounds = array<i64: 1>, scalar_prefetch = 0 : i64, scratch_operands = 0 : i64, tpu.core_type = #tpu.core_type<tc>, window_params = [{transform_indices = @transform_0, window_bounds = array<i64: 64, 16>}, {pipeline_mode = #tpu.pipeline_mode<synchronous>, transform_indices = @transform_1, window_bounds = array<i64: 16, 32>}, {pipeline_mode = #tpu.pipeline_mode<synchronous>, transform_indices = @transform_2, window_bounds = array<i64: 1, 32>}, {pipeline_mode = #tpu.pipeline_mode<synchronous>, transform_indices = @transform_3, window_bounds = array<i64: 32, 32>}, {pipeline_mode = #tpu.pipeline_mode<synchronous>, transform_indices = @transform_4, window_bounds = array<i64: 1, 32>}, {pipeline_mode = #tpu.pipeline_mode<synchronous>, transform_indices = @transform_5, window_bounds = array<i64: 32, 8>}, {pipeline_mode = #tpu.pipeline_mode<synchronous>, transform_indices = @transform_6, window_bounds = array<i64: 1, 8>}, {transform_indices = @transform_7, window_bounds = array<i64: 64, 8>}]} {
    %c0 = arith.constant 0 : index
    %c0_0 = arith.constant 0 : index
    %0 = vector.load %arg1[%c0, %c0_0] : memref<64x16xf32, #tpu.memory_space<vmem>>, vector<64x16xf32>
    %c0_1 = arith.constant 0 : index
    %c0_2 = arith.constant 0 : index
    %1 = vector.load %arg2[%c0_1, %c0_2] : memref<16x32xf32, #tpu.memory_space<vmem>>, vector<16x32xf32>
    %cst = arith.constant dense<0.000000e+00> : vector<64x32xf32>
    %2 = tpu.matmul %0, %1, %cst {dimension_numbers = #tpu.dot_dimension_numbers<[1], [0], [0], [1], [0, 0, 1, 1], [], []>} : vector<64x16xf32>, vector<16x32xf32>, vector<64x32xf32> -> vector<64x32xf32>
    %c0_3 = arith.constant 0 : index
    %c0_4 = arith.constant 0 : index
    %3 = vector.load %arg3[%c0_3, %c0_4] : memref<1x32xf32, #tpu.memory_space<vmem>>, vector<1x32xf32>
    %4 = vector.broadcast %3 : vector<1x32xf32> to vector<64x32xf32>
    %5 = arith.addf %2, %4 : vector<64x32xf32>
    %cst_5 = arith.constant 0.000000e+00 : f32
    %6 = vector.broadcast %cst_5 : f32 to vector<64x32xf32>
    %7 = arith.maximumf %5, %6 : vector<64x32xf32>
    %c0_6 = arith.constant 0 : index
    %c0_7 = arith.constant 0 : index
    %8 = vector.load %arg4[%c0_6, %c0_7] : memref<32x32xf32, #tpu.memory_space<vmem>>, vector<32x32xf32>
    %cst_8 = arith.constant dense<0.000000e+00> : vector<64x32xf32>
    %9 = tpu.matmul %7, %8, %cst_8 {dimension_numbers = #tpu.dot_dimension_numbers<[1], [0], [0], [1], [0, 0, 1, 1], [], []>} : vector<64x32xf32>, vector<32x32xf32>, vector<64x32xf32> -> vector<64x32xf32>
    %c0_9 = arith.constant 0 : index
    %c0_10 = arith.constant 0 : index
    %10 = vector.load %arg5[%c0_9, %c0_10] : memref<1x32xf32, #tpu.memory_space<vmem>>, vector<1x32xf32>
    %11 = vector.broadcast %10 : vector<1x32xf32> to vector<64x32xf32>
    %12 = arith.addf %9, %11 : vector<64x32xf32>
    %cst_11 = arith.constant 0.000000e+00 : f32
    %13 = vector.broadcast %cst_11 : f32 to vector<64x32xf32>
    %14 = arith.maximumf %12, %13 : vector<64x32xf32>
    %c0_12 = arith.constant 0 : index
    %c0_13 = arith.constant 0 : index
    %15 = vector.load %arg6[%c0_12, %c0_13] : memref<32x8xf32, #tpu.memory_space<vmem>>, vector<32x8xf32>
    %cst_14 = arith.constant dense<0.000000e+00> : vector<64x8xf32>
    %16 = tpu.matmul %14, %15, %cst_14 {dimension_numbers = #tpu.dot_dimension_numbers<[1], [0], [0], [1], [0, 0, 1, 1], [], []>} : vector<64x32xf32>, vector<32x8xf32>, vector<64x8xf32> -> vector<64x8xf32>
    %c0_15 = arith.constant 0 : index
    %c0_16 = arith.constant 0 : index
    %17 = vector.load %arg7[%c0_15, %c0_16] : memref<1x8xf32, #tpu.memory_space<vmem>>, vector<1x8xf32>
    %18 = vector.broadcast %17 : vector<1x8xf32> to vector<64x8xf32>
    %19 = arith.addf %16, %18 : vector<64x8xf32>
    %cst_17 = arith.constant dense<0xFF800000> : vector<64xf32>
    %20 = vector.multi_reduction <maximumf>, %19, %cst_17 [1] : vector<64x8xf32> to vector<64xf32>
    %21 = vector.shape_cast %20 : vector<64xf32> to vector<64x1xf32>
    %22 = vector.broadcast %21 : vector<64x1xf32> to vector<64x8xf32>
    %23 = arith.subf %19, %22 : vector<64x8xf32>
    %24 = math.exp %23 : vector<64x8xf32>
    %cst_18 = arith.constant dense<0.000000e+00> : vector<64xf32>
    %25 = vector.multi_reduction <add>, %24, %cst_18 [1] : vector<64x8xf32> to vector<64xf32>
    %26 = vector.shape_cast %25 : vector<64xf32> to vector<64x1xf32>
    %27 = vector.broadcast %26 : vector<64x1xf32> to vector<64x8xf32>
    %28 = arith.divf %24, %27 : vector<64x8xf32>
    %c0_19 = arith.constant 0 : index
    %c0_20 = arith.constant 0 : index
    %29 = vector.load %arg8[%c0_19, %c0_20] : memref<64x8xf32, #tpu.memory_space<vmem>>, vector<64x8xf32>
    tpu.vector_store %arg8[%c0_19, %c0_20], %28 {strides = array<i32>} : memref<64x8xf32, #tpu.memory_space<vmem>>, vector<64x8xf32>,
    return
  }
  func.func @transform_0(%arg0: i32) -> (i32, i32) {
    %c0_i32 = arith.constant 0 : i32
    %c0_i32_0 = arith.constant 0 : i32
    return %arg0, %c0_i32 : i32, i32
  }
  func.func @transform_1(%arg0: i32) -> (i32, i32) {
    %c0_i32 = arith.constant 0 : i32
    %c0_i32_0 = arith.constant 0 : i32
    %c0_i32_1 = arith.constant 0 : i32
    return %c0_i32, %c0_i32_0 : i32, i32
  }
  func.func @transform_2(%arg0: i32) -> (i32, i32) {
    %c0_i32 = arith.constant 0 : i32
    %c0_i32_0 = arith.constant 0 : i32
    %c0_i32_1 = arith.constant 0 : i32
    return %c0_i32, %c0_i32_0 : i32, i32
  }
  func.func @transform_3(%arg0: i32) -> (i32, i32) {
    %c0_i32 = arith.constant 0 : i32
    %c0_i32_0 = arith.constant 0 : i32
    %c0_i32_1 = arith.constant 0 : i32
    return %c0_i32, %c0_i32_0 : i32, i32
  }
  func.func @transform_4(%arg0: i32) -> (i32, i32) {
    %c0_i32 = arith.constant 0 : i32
    %c0_i32_0 = arith.constant 0 : i32
    %c0_i32_1 = arith.constant 0 : i32
    return %c0_i32, %c0_i32_0 : i32, i32
  }
  func.func @transform_5(%arg0: i32) -> (i32, i32) {
    %c0_i32 = arith.constant 0 : i32
    %c0_i32_0 = arith.constant 0 : i32
    %c0_i32_1 = arith.constant 0 : i32
    return %c0_i32, %c0_i32_0 : i32, i32
  }
  func.func @transform_6(%arg0: i32) -> (i32, i32) {
    %c0_i32 = arith.constant 0 : i32
    %c0_i32_0 = arith.constant 0 : i32
    %c0_i32_1 = arith.constant 0 : i32
    return %c0_i32, %c0_i32_0 : i32, i32
  }
  func.func @transform_7(%arg0: i32) -> (i32, i32) {
    %c0_i32 = arith.constant 0 : i32
    %c0_i32_0 = arith.constant 0 : i32
    return %arg0, %c0_i32 : i32, i32
  }
}

</mosaic_0001>

<bundles_post_ra>
// kernel: actor_forward.1
= control target key start
LH: loop header
LB: loop body
LE: loop exit
PB: predicated region body
PF: predicated region fallthrough
CT: control target
= control target key end

     0   :  { %vm43_vm0 = vcmask 130048   ;;  %vm192_vm1 = vcmask 261120   ;;  %vm470_vm2 = vcmask 64512   ;;  %s917_s1 = inlined_call_operand.vmem [shape: f32[16,32], index: 1, kind: input, shape index: {}]   ;;  %s918_s0 = inlined_call_operand.vmem [shape: f32[64,16], index: 0, kind: input, shape index: {}]   ;;  %s919_s3 = inlined_call_operand.vmem [shape: f32[32,32], index: 3, kind: input, shape index: {}]   ;;  %s920_s5 = inlined_call_operand.vmem [shape: f32[32,8], index: 5, kind: input, shape index: {}]   ;;  %s921_s2 = inlined_call_operand.vmem [shape: f32[1,32], index: 2, kind: input, shape index: {}]   ;;  %s922_s4 = inlined_call_operand.vmem [shape: f32[1,32], index: 4, kind: input, shape index: {}]   ;;  %s923_s6 = inlined_call_operand.vmem [shape: f32[1,8], index: 6, kind: input, shape index: {}]   ;;  %s924_s7 = inlined_call_operand.vmem [shape: f32[64,8], index: 7, kind: output, shape index: {}]  }
   0x1   :  { %v34_v0 = vld [vmem:[%s917_s1] sm:$0xff]  ;;  %v35_v1 = vld [vmem:[%s917_s1 + $0x8] sm:$0xff]  ;;  %v28_v10 = vld [vmem:[%s918_s0 + $0x10] sm:$0xff] }
   0x2   :  { %v26_v2 = vld [vmem:[%s918_s0] sm:$0xff]  ;;  %v688_v3 = vpack.c.bf16 %v35_v1, %v34_v0  ;;  %v182_v6 = vld [vmem:[%s919_s3 + $0x8] sm:$0xff]  ;;  %v32_v11 = vld [vmem:[%s918_s0 + $0x30] sm:$0xff] }
   0x3   :  { %636 = vmatprep.mubr.msk.f32.mxu0 %vm43_vm0, %v26_v2  ;;  %v30_v4 = vld [vmem:[%s918_s0 + $0x20] sm:$0xff]  ;;  %v27_v7 = vld [vmem:[%s918_s0 + $0x8] sm:$0xff]  ;;  %v29_v12 = vld [vmem:[%s918_s0 + $0x18] sm:$0xff] }
   0x4   :  { %689 = vmatprep.subr.bf16.mxu0 %v688_v3  ;;  %708 = vmatprep.subr.bf16.mxu1 %v688_v3  ;;  %v181_v5 = vld [vmem:[%s919_s3] sm:$0xff]  ;;  %v31_v8 = vld [vmem:[%s918_s0 + $0x28] sm:$0xff]  ;;  %v33_v13 = vld [vmem:[%s918_s0 + $0x38] sm:$0xff] }
   0x5   :  { %691 = vmatpush3.bf16.msra.mxu0 %v688_v3  ;;  %709 = vmatpush3.bf16.msra.mxu1 %v688_v3  ;;  %v692_v9 = vpack.c.bf16 %v182_v6, %v181_v5  ;;  %v183_v14 = vld [vmem:[%s919_s3 + $0x10] sm:$0xff]  ;;  %v184_v15 = vld [vmem:[%s919_s3 + $0x18] sm:$0xff]  ;;  %v330_v17 = vld [vmem:[%s920_s5] sm:$0xff] }
   0x6   :  { %642 = vmatprep.mubr.msk.f32.mxu1 %vm43_vm0, %v30_v4  ;;  %v696_v16 = vpack.c.bf16 %v184_v15, %v183_v14  ;;  %v331_v18 = vld [vmem:[%s920_s5 + $0x8] sm:$0xff]  ;;  %v571_v20 = vld [vmem:[%s921_s2] ss:$0 sm:$0xff]  ;;  %v332_v45 = vld [vmem:[%s920_s5 + $0x10] sm:$0xff] }
   0x7   :  { %693 = vmatprep.subr.bf16.mxu1 %v692_v9  ;;  %v700_v19 = vpack.c.bf16 %v331_v18, %v330_v17  ;;  %v333_v46 = vld [vmem:[%s920_s5 + $0x18] sm:$0xff]  ;;  %v580_v48 = vld [vmem:[%s922_s4] ss:$0 sm:$0xff] }
   0x8   :  { %637 = vmatmul.mubr.msk.f32.vlgmr.msra.gmra.mrb[0].mxu0 %vm43_vm0, %v27_v7  ;;  %643 = vmatmul.mubr.msk.f32.vlgmr.msra.gmra.mrb[0].mxu1 %vm43_vm0, %v31_v8  ;;  %v704_v47 = vpack.c.bf16 %v333_v46, %v332_v45 }
   0x9   :  { %639 = vmatprep.mubr.msk.f32.mxu0 %vm43_vm0, %v28_v10  ;;  %645 = vmatprep.mubr.msk.f32.mxu1 %vm43_vm0, %v32_v11 }
   0xa   :  { %695 = vmatpush3.bf16.msra.mxu1 %v692_v9  ;;  %701 = vmatprep.subr.bf16.mxu0 %v700_v19  ;;  %v589_v9 = vld [vmem:[%s923_s6] ss:$0 sm:$0xff] }
   0xb   :  { %697 = vmatprep.subr.bf16.mxu1 %v696_v16  ;;  %703 = vmatpush3.bf16.msra.mxu0 %v700_v19 }
   0xc   :  { %640 = vmatmul.mubr.msk.f32.gmra.mrb[2].mxu0 %vm43_vm0, %v29_v12  ;;  %646 = vmatmul.mubr.msk.f32.gmra.mrb[2].mxu1 %vm43_vm0, %v33_v13 }
   0xd   :  { %705 = vmatprep.subr.bf16.mxu0 %v704_v47 }
   0xe   :  { %699 = vmatpush3.bf16.msra.mxu1 %v696_v16 }
   0xf   :  { %707 = vmatpush3.bf16.msra.mxu0 %v704_v47 }
  0xdb   :  { %v638_v21 = vpop.f32.mrb[0].mxu0  ;;  %v644_v22 = vpop.f32.mrb[0].mxu1 }
  0xdc   :  { %v140_v23 = vadd.f32 %v638_v21, %v571_v20  ;;  %v134_v24 = vpop.f32.mrb[1].mxu0  ;;  %v154_v25 = vpop.f32.mrb[1].mxu1  ;;  %v160_v36 = vadd.f32 %v644_v22, %v571_v20 }
  0xdd   :  { %v135_v26 = vadd.f32 %v571_v20, %v134_v24  ;;  %v155_v29 = vadd.f32 %v571_v20, %v154_v25 }
  0xde   :  { %v174_v31 = vmax.f32 %v140_v23, 0.0  ;;  %v178_v41 = vmax.f32 %v160_v36, 0.0 }
  0xdf   :  { %v173_v27 = vmax.f32 %v135_v26, 0.0  ;;  %v641_v28 = vpop.f32.mrb[2].mxu0  ;;  %v647_v30 = vpop.f32.mrb[2].mxu1  ;;  %v177_v38 = vmax.f32 %v155_v29, 0.0 }
  0xe0   :  { %v150_v32 = vadd.f32 %v641_v28, %v571_v20  ;;  %v144_v33 = vpop.f32.mrb[3].mxu0  ;;  %v164_v34 = vpop.f32.mrb[3].mxu1  ;;  %v170_v42 = vadd.f32 %v647_v30, %v571_v20 }
  0xe1   :  { %v145_v35 = vadd.f32 %v571_v20, %v144_v33  ;;  %656 = vmatprep.mubr.msk.f32.mxu1 %vm192_vm1, %v173_v27  ;;  %v165_v39 = vadd.f32 %v571_v20, %v164_v34 }
  0xe2   :  { %657 = vmatmul.mubr.msk.f32.vlgmr.msra.gmra.mrb[4].mxu1 %vm192_vm1, %v174_v31  ;;  %v176_v40 = vmax.f32 %v150_v32, 0.0  ;;  %v180_v44 = vmax.f32 %v170_v42, 0.0 }
  0xe3   :  { %v175_v37 = vmax.f32 %v145_v35, 0.0  ;;  %v179_v43 = vmax.f32 %v165_v39, 0.0 }
  0xe5   :  { %659 = vmatprep.mubr.msk.f32.mxu1 %vm192_vm1, %v175_v37 }
  0xe6   :  { %660 = vmatmul.mubr.msk.f32.gmra.mrb[6].mxu1 %vm192_vm1, %v176_v40 }
  0xe7   :  { %662 = vmatprep.mubr.msk.f32.mxu1 %vm192_vm1, %v177_v38 }
  0xea   :  { %663 = vmatmul.mubr.msk.f32.gmra.mrb[8].mxu1 %vm192_vm1, %v178_v41 }
  0xeb   :  { %665 = vmatprep.mubr.msk.f32.mxu1 %vm192_vm1, %v179_v43 }
  0xee   :  { %666 = vmatmul.mubr.msk.f32.gmra.mrb[10].mxu1 %vm192_vm1, %v180_v44 }
 0x1b5   :  { %v658_v49 = vpop.f32.mrb[4].mxu1 }
 0x1b6   :  { %v289_v50 = vadd.f32 %v658_v49, %v580_v48  ;;  %v283_v51 = vpop.f32.mrb[5].mxu1 }
 0x1b7   :  { %v284_v52 = vadd.f32 %v580_v48, %v283_v51 }
 0x1b8   :  { %v323_v55 = vmax.f32 %v289_v50, 0.0 }
 0x1b9   :  { %v322_v53 = vmax.f32 %v284_v52, 0.0  ;;  %v661_v54 = vpop.f32.mrb[6].mxu1 }
 0x1ba   :  { %v299_v56 = vadd.f32 %v661_v54, %v580_v48  ;;  %v293_v57 = vpop.f32.mrb[7].mxu1 }
 0x1bb   :  { %v294_v58 = vadd.f32 %v580_v48, %v293_v57  ;;  %676 = vmatprep.mubr.msk.f32.mxu0 %vm192_vm1, %v322_v53 }
 0x1bc   :  { %677 = vmatmul.mubr.msk.f32.vlgmr.msra.gmra.mrb[4].mxu0 %vm192_vm1, %v323_v55  ;;  %v325_v61 = vmax.f32 %v299_v56, 0.0 }
 0x1bd   :  { %v324_v59 = vmax.f32 %v294_v58, 0.0  ;;  %v664_v60 = vpop.f32.mrb[8].mxu1 }
 0x1be   :  { %v309_v62 = vadd.f32 %v664_v60, %v580_v48  ;;  %v303_v63 = vpop.f32.mrb[9].mxu1 }
 0x1bf   :  { %v304_v0 = vadd.f32 %v580_v48, %v303_v63  ;;  %679 = vmatprep.mubr.msk.f32.mxu0 %vm192_vm1, %v324_v59 }
 0x1c0   :  { %v327_v1 = vmax.f32 %v309_v62, 0.0  ;;  %680 = vmatmul.mubr.msk.f32.gmra.mrb[6].mxu0 %vm192_vm1, %v325_v61 }
 0x1c1   :  { %v326_v2 = vmax.f32 %v304_v0, 0.0  ;;  %v667_v3 = vpop.f32.mrb[10].mxu1 }
 0x1c2   :  { %v319_v4 = vadd.f32 %v667_v3, %v580_v48  ;;  %v313_v5 = vpop.f32.mrb[11].mxu1 }
 0x1c3   :  { %v314_v6 = vadd.f32 %v580_v48, %v313_v5  ;;  %682 = vmatprep.mubr.msk.f32.mxu0 %vm192_vm1, %v326_v2 }
 0x1c4   :  { %v329_v7 = vmax.f32 %v319_v4, 0.0  ;;  %683 = vmatmul.mubr.msk.f32.gmra.mrb[8].mxu0 %vm192_vm1, %v327_v1 }
 0x1c5   :  { %v328_v8 = vmax.f32 %v314_v6, 0.0 }
 0x1c7   :  { %685 = vmatprep.mubr.msk.f32.mxu0 %vm192_vm1, %v328_v8 }
 0x1c8   :  { %686 = vmatmul.mubr.msk.f32.gmra.mrb[10].mxu0 %vm192_vm1, %v329_v7 }
 0x28f   :  { %v678_v10 = vpop.f32.mrb[4].mxu0 }
 0x290   :  { %v437_v11 = vadd.f32 %v678_v10, %v589_v9  ;;  %v431_v12 = vpop.f32.mrb[5].mxu0 }
 0x291   :  { %v432_v13 = vadd.f32 %v589_v9, %v431_v12 }
 0x292   :  { %v474_v14 = vsel %vm470_vm2, %v437_v11, -inf }
 0x293   :  { %475 = vmax.xlane.f32.xlu0 %v474_v14  ;;  %v681_v15 = vpop.f32.mrb[6].mxu0  ;;  %v471_v20 = vsel %vm470_vm2, %v432_v13, -inf }
 0x294   :  { %v447_v16 = vadd.f32 %v681_v15, %v589_v9  ;;  %v441_v17 = vpop.f32.mrb[7].mxu0 }
 0x295   :  { %v442_v18 = vadd.f32 %v589_v9, %v441_v17 }
 0x296   :  { %v480_v19 = vsel %vm470_vm2, %v447_v16, -inf }
 0x297   :  { %481 = vmax.xlane.f32.xlu1 %v480_v19  ;;  %v684_v21 = vpop.f32.mrb[8].mxu0  ;;  %472 = vmax.xlane.f32.xlu0 %v471_v20  ;;  %v477_v25 = vsel %vm470_vm2, %v442_v18, -inf }
 0x298   :  { %v451_v22 = vpop.f32.mrb[9].mxu0  ;;  %v457_v24 = vadd.f32 %v684_v21, %v589_v9 }
 0x299   :  { %v452_v23 = vadd.f32 %v589_v9, %v451_v22 }
 0x29a   :  { %v486_v31 = vsel %vm470_vm2, %v457_v24, -inf }
 0x29b   :  { %v687_v26 = vpop.f32.mrb[10].mxu0  ;;  %478 = vmax.xlane.f32.xlu1 %v477_v25  ;;  %v483_v27 = vsel %vm470_vm2, %v452_v23, -inf }
 0x29c   :  { %v461_v28 = vpop.f32.mrb[11].mxu0  ;;  %484 = vmax.xlane.f32.xlu0 %v483_v27  ;;  %v467_v30 = vadd.f32 %v687_v26, %v589_v9 }
 0x29d   :  { %v462_v29 = vadd.f32 %v589_v9, %v461_v28 }
 0x29e   :  { %v492_v33 = vsel %vm470_vm2, %v467_v30, -inf }
 0x29f   :  { %487 = vmax.xlane.f32.xlu1 %v486_v31  ;;  %v489_v32 = vsel %vm470_vm2, %v462_v29, -inf }
 0x2a0   :  { %490 = vmax.xlane.f32.xlu0 %v489_v32 }
 0x2a3   :  { %493 = vmax.xlane.f32.xlu1 %v492_v33 }
 0x320   :  { %v476_v34 = vpop.xlane.xlu0 %475 }
 0x321   :  { %v496_v35 = vsub.f32 %v437_v11, %v476_v34 }
 0x323   :  { %v505_v36 = vmul.f32 1.442695, %v496_v35 }
 0x324   :  { %v482_v37 = vpop.xlane.xlu1 %481  ;;  %v473_v38 = vpop.xlane.xlu0 %472 }
 0x325   :  { %710 = vpow2.f32 %v505_v36  ;;  %v498_v39 = vsub.f32 %v447_v16, %v482_v37  ;;  %v495_v40 = vsub.f32 %v432_v13, %v473_v38 }
 0x327   :  { %v509_v41 = vmul.f32 1.442695, %v498_v39  ;;  %v503_v42 = vmul.f32 1.442695, %v495_v40 }
 0x328   :  { %v479_v43 = vpop.xlane.xlu1 %478 }
 0x329   :  { %712 = vpow2.f32 %v509_v41  ;;  %v497_v44 = vsub.f32 %v442_v18, %v479_v43  ;;  %v485_v45 = vpop.xlane.xlu0 %484 }
 0x32a   :  { %714 = vpow2.f32 %v503_v42  ;;  %v499_v46 = vsub.f32 %v452_v23, %v485_v45 }
 0x32b   :  { %v507_v47 = vmul.f32 1.442695, %v497_v44 }
 0x32c   :  { %v511_v48 = vmul.f32 1.442695, %v499_v46  ;;  %v488_v49 = vpop.xlane.xlu1 %487 }
 0x32d   :  { %716 = vpow2.f32 %v507_v47  ;;  %v500_v50 = vsub.f32 %v457_v24, %v488_v49  ;;  %v491_v51 = vpop.xlane.xlu0 %490 }
 0x32e   :  { %v501_v52 = vsub.f32 %v462_v29, %v491_v51  ;;  %718 = vpow2.f32 %v511_v48 }
 0x32f   :  { %v711_v53 = vpop.eup %710  ;;  %v513_v54 = vmul.f32 1.442695, %v500_v50 }
 0x330   :  { %v515_v55 = vmul.f32 1.442695, %v501_v52  ;;  %v494_v56 = vpop.xlane.xlu1 %493  ;;  %v522_v57 = vsel %vm470_vm2, %v711_v53, 0.0 }
 0x331   :  { %720 = vpow2.f32 %v513_v54  ;;  %v502_v58 = vsub.f32 %v467_v30, %v494_v56  ;;  %523 = vadd.xlane.f32.xlu1 %v522_v57 }
 0x332   :  { %722 = vpow2.f32 %v515_v55 }
 0x333   :  { %v713_v59 = vpop.eup %712  ;;  %v517_v60 = vmul.f32 1.442695, %v502_v58 }
 0x334   :  { %v715_v61 = vpop.eup %714  ;;  %v528_v62 = vsel %vm470_vm2, %v713_v59, 0.0 }
 0x335   :  { %724 = vpow2.f32 %v517_v60  ;;  %529 = vadd.xlane.f32.xlu1 %v528_v62  ;;  %v519_v63 = vsel %vm470_vm2, %v715_v61, 0.0 }
 0x336   :  { %520 = vadd.xlane.f32.xlu0 %v519_v63 }
 0x337   :  { %v717_v0 = vpop.eup %716 }
 0x338   :  { %v525_v1 = vsel %vm470_vm2, %v717_v0, 0.0  ;;  %v719_v2 = vpop.eup %718 }
 0x339   :  { %v531_v5 = vsel %vm470_vm2, %v719_v2, 0.0 }
 0x33a   :  { %526 = vadd.xlane.f32.xlu0 %v525_v1 }
 0x33b   :  { %v721_v3 = vpop.eup %720 }
 0x33c   :  { %v534_v4 = vsel %vm470_vm2, %v721_v3, 0.0  ;;  %v723_v6 = vpop.eup %722 }
 0x33d   :  { %535 = vadd.xlane.f32.xlu1 %v534_v4  ;;  %v537_v9 = vsel %vm470_vm2, %v723_v6, 0.0 }
 0x33e   :  { %532 = vadd.xlane.f32.xlu0 %v531_v5 }
 0x33f   :  { %v725_v7 = vpop.eup %724 }
 0x340   :  { %v540_v8 = vsel %vm470_vm2, %v725_v7, 0.0 }
 0x341   :  { %541 = vadd.xlane.f32.xlu1 %v540_v8 }
 0x342   :  { %538 = vadd.xlane.f32.xlu0 %v537_v9 }
 0x3be   :  { %v524_v10 = vpop.xlane.xlu1 %523 }
 0x3bf   :  { %726 = vrcp.f32 %v524_v10 }
 0x3c2   :  { %v530_v11 = vpop.xlane.xlu1 %529 }
 0x3c3   :  { %728 = vrcp.f32 %v530_v11  ;;  %v521_v12 = vpop.xlane.xlu0 %520 }
 0x3c4   :  { %730 = vrcp.f32 %v521_v12 }
 0x3c7   :  { %v527_v13 = vpop.xlane.xlu0 %526 }
 0x3c8   :  { %732 = vrcp.f32 %v527_v13 }
 0x3c9   :  { %v727_v14 = vpop.eup %726 }
 0x3ca   :  { %v546_v15 = vmul.f32 %v727_v14, %v711_v53  ;;  %v536_v16 = vpop.xlane.xlu1 %535 }
 0x3cb   :  { %734 = vrcp.f32 %v536_v16  ;;  %v533_v17 = vpop.xlane.xlu0 %532 }
 0x3cc   :  { %560 = vst.msk [vmem:[%s924_s7 + $0x8] sm:$0xff] %vm470_vm2, %v546_v15  ;;  %736 = vrcp.f32 %v533_v17 }
 0x3cd   :  { %v729_v18 = vpop.eup %728 }
 0x3ce   :  { %v731_v19 = vpop.eup %730  ;;  %v550_v20 = vmul.f32 %v729_v18, %v713_v59  ;;  %v542_v21 = vpop.xlane.xlu1 %541 }
 0x3cf   :  { %v544_v22 = vmul.f32 %v731_v19, %v715_v61  ;;  %738 = vrcp.f32 %v542_v21  ;;  %v539_v23 = vpop.xlane.xlu0 %538 }
 0x3d0   :  { %562 = vst.msk [vmem:[%s924_s7 + $0x18] sm:$0xff] %vm470_vm2, %v550_v20  ;;  %740 = vrcp.f32 %v539_v23 }
 0x3d1   :  { %559 = vst.msk [vmem:[%s924_s7] sm:$0xff] %vm470_vm2, %v544_v22 }
 0x3d2   :  { %v733_v24 = vpop.eup %732 }
 0x3d3   :  { %v548_v25 = vmul.f32 %v733_v24, %v717_v0 }
 0x3d5   :  { %v735_v26 = vpop.eup %734  ;;  %561 = vst.msk [vmem:[%s924_s7 + $0x10] sm:$0xff] %vm470_vm2, %v548_v25 }
 0x3d6   :  { %v737_v27 = vpop.eup %736  ;;  %v554_v28 = vmul.f32 %v735_v26, %v721_v3 }
 0x3d7   :  { %v552_v29 = vmul.f32 %v737_v27, %v719_v2 }
 0x3d8   :  { %564 = vst.msk [vmem:[%s924_s7 + $0x28] sm:$0xff] %vm470_vm2, %v554_v28 }
 0x3d9   :  { %v739_v30 = vpop.eup %738  ;;  %563 = vst.msk [vmem:[%s924_s7 + $0x20] sm:$0xff] %vm470_vm2, %v552_v29 }
 0x3da   :  { %v741_v31 = vpop.eup %740  ;;  %v558_v32 = vmul.f32 %v739_v30, %v725_v7 }
 0x3db   :  { %v556_v33 = vmul.f32 %v741_v31, %v723_v6 }
 0x3dc   :  { %566 = vst.msk [vmem:[%s924_s7 + $0x38] sm:$0xff] %vm470_vm2, %v558_v32 }
 0x3dd   :  { %565 = vst.msk [vmem:[%s924_s7 + $0x30] sm:$0xff] %vm470_vm2, %v556_v33 }

</bundles_post_ra>
